<compile_context>
chip_gen: v5e
topology: v5e:2x2
jax: 0.10.0
libtpu: 0.0.40
codegen_flags: <defaults>
</compile_context>

<pallas_src>
import functools

import jax
import jax.numpy as jnp
from jax.experimental import pallas as pl
from jax.experimental.pallas import tpu as pltpu


def _space_to_depth_kernel(x_ref, o_ref, tmp_ref, tmp2_ref, *, block_size):
    # x_ref   : (C, th*bs, W)      NCHW input tile (one batch element, th*bs rows)
    # o_ref   : (C*bs*bs, th, Wb)  NCHW output tile
    # tmp_ref : (W, th*bs)         scratch: transposed channel plane
    # tmp2_ref: (th*bs, Wb)        scratch: W-deinterleaved channel plane
    bs = block_size
    C, Ht, W = x_ref.shape
    th = Ht // bs
    Wb = W // bs

    for c in range(C):  # static unroll; C is small for this module
        # Move W off the lane axis so the W de-interleave below becomes a cheap
        # sublane-strided read instead of a lane-strided gather.
        tmp_ref[...] = x_ref[c].T                                     # (W, Ht)
        for wib in range(bs):
            # rows wib, wib+bs, ... of the transposed plane == input columns wib::bs
            tmp2_ref[...] = tmp_ref[pl.ds(wib, Wb, stride=bs), :].T   # (Ht, Wb)
            for hib in range(bs):
                d = (hib * bs + wib) * C + c
                # rows hib::bs -> output rows; contiguous full-width slab store
                o_ref[d, :, :] = tmp2_ref[pl.ds(hib, th, stride=bs), :]  # (th, Wb)


def _pick_h_tile(Hb, C, W, bs, itemsize, max_block_bytes):
    # th must divide Hb and be a multiple of 8 (or equal Hb) so block shapes
    # satisfy the (8,128)-or-full-dim rule on the last two dims.
    cands = [t for t in range(8, Hb + 1, 8) if Hb % t == 0]
    if Hb not in cands:
        cands.append(Hb)
    cands.sort()

    def in_block_bytes(t):
        return C * (t * bs) * W * itemsize

    fitting = [t for t in cands if in_block_bytes(t) <= max_block_bytes]
    return max(fitting) if fitting else cands[0]


def space_to_depth(x_nchw, block_size, *, max_block_bytes=8 * 1024 * 1024):
    B, C, H, W = x_nchw.shape
    bs = block_size
    assert H % bs == 0 and W % bs == 0
    Hb, Wb = H // bs, W // bs
    D = C * bs * bs
    itemsize = jnp.dtype(x_nchw.dtype).itemsize

    th = _pick_h_tile(Hb, C, W, bs, itemsize, max_block_bytes)
    Ht = th * bs
    n_h_tiles = Hb // th

    kernel = functools.partial(_space_to_depth_kernel, block_size=bs)

    return pl.pallas_call(
        kernel,
        out_shape=jax.ShapeDtypeStruct((B, D, Hb, Wb), x_nchw.dtype),
        grid_spec=pltpu.PrefetchScalarGridSpec(
            num_scalar_prefetch=0,
            grid=(B, n_h_tiles),
            in_specs=[
                pl.BlockSpec((pl.Squeezed(), C, Ht, W), lambda b, i: (b, 0, i, 0)),
            ],
            out_specs=pl.BlockSpec(
                (pl.Squeezed(), D, th, Wb), lambda b, i: (b, 0, i, 0)
            ),
            scratch_shapes=[
                pltpu.VMEM((W, Ht), x_nchw.dtype),
                pltpu.VMEM((Ht, Wb), x_nchw.dtype),
            ],
        ),
        compiler_params=pltpu.CompilerParams(
            dimension_semantics=("parallel", "parallel"),
            vmem_limit_bytes=48 * 1024 * 1024,
        ),
        cost_estimate=pl.CostEstimate(
            flops=0,
            transcendentals=0,
            bytes_accessed=2 * x_nchw.size * itemsize,
        ),
    )(x_nchw)


def _reference_space_to_depth(x, bs):
    # Pure-JAX re-implementation of the PyTorch forward (for verification).
    B, C, H, W = x.shape
    y = jnp.transpose(x, (0, 2, 3, 1))                    # B,H,W,C
    y = y.reshape(B, H // bs, bs, W // bs, bs, C)         # B,Hb,hib,Wb,wib,C
    y = jnp.transpose(y, (0, 1, 3, 2, 4, 5))              # B,Hb,Wb,hib,wib,C
    y = y.reshape(B, H // bs, W // bs, bs * bs * C)       # B,Hb,Wb,D
    return jnp.transpose(y, (0, 3, 1, 2))                 # B,D,Hb,Wb


if __name__ == "__main__":
    key = jax.random.PRNGKey(0)
    block_size = 2
    x = jax.random.normal(key, (2, 4, 16, 16), dtype=jnp.float32)  # NCHW

    out = space_to_depth(x, block_size)
    out = jax.block_until_ready(out)

    expected = _reference_space_to_depth(x, block_size)
    assert out.shape == (2, 4 * block_size * block_size, 8, 8), out.shape
    assert out.dtype == x.dtype
    assert jnp.allclose(out, expected), "mismatch vs reference space-to-depth"

    print("KERNEL_OK")
</pallas_src>

<mosaic_0001>
module attributes {stable_mosaic.version = 11 : i64} {
  func.func @_space_to_depth_kernel(%arg0: i32, %arg1: i32, %arg2: memref<1x4x16x16xf32, #tpu.memory_space<vmem>>, %arg3: memref<1x16x8x8xf32, #tpu.memory_space<vmem>>, %arg4: memref<16x16xf32, #tpu.memory_space<vmem>>, %arg5: memref<16x8xf32, #tpu.memory_space<vmem>>) attributes {dimension_semantics = [#tpu.dimension_semantics<parallel>, #tpu.dimension_semantics<parallel>], iteration_bounds = array<i64: 2, 1>, scalar_prefetch = 0 : i64, scratch_operands = 2 : i64, tpu.core_type = #tpu.core_type<tc>, window_params = [{transform_indices = @transform_0, window_bounds = array<i64: 1, 4, 16, 16>}, {transform_indices = @transform_1, window_bounds = array<i64: 1, 16, 8, 8>}]} {
    %c0 = arith.constant 0 : index
    %c0_0 = arith.constant 0 : index
    %c0_1 = arith.constant 0 : index
    %c0_2 = arith.constant 0 : index
    %0 = vector.load %arg2[%c0, %c0_0, %c0_1, %c0_2] : memref<1x4x16x16xf32, #tpu.memory_space<vmem>>, vector<1x1x16x16xf32>
    %1 = vector.shape_cast %0 : vector<1x1x16x16xf32> to vector<16x16xf32>
    %2 = tpu.transpose %1, [1, 0] : vector<16x16xf32> -> vector<16x16xf32>
    %c0_3 = arith.constant 0 : index
    %c0_4 = arith.constant 0 : index
    %3 = vector.load %arg4[%c0_3, %c0_4] : memref<16x16xf32, #tpu.memory_space<vmem>>, vector<16x16xf32>
    tpu.vector_store %arg4[%c0_3, %c0_4], %2 {strides = array<i32>} : memref<16x16xf32, #tpu.memory_space<vmem>>, vector<16x16xf32>,
    %c0_5 = arith.constant 0 : index
    %c0_6 = arith.constant 0 : index
    %4 = tpu.strided_load %arg4[%c0_5, %c0_6] {strides = array<i32: 2, 1>} : memref<16x16xf32, #tpu.memory_space<vmem>>, vector<8x16xf32>
    %5 = tpu.transpose %4, [1, 0] : vector<8x16xf32> -> vector<16x8xf32>
    %c0_7 = arith.constant 0 : index
    %c0_8 = arith.constant 0 : index
    %6 = vector.load %arg5[%c0_7, %c0_8] : memref<16x8xf32, #tpu.memory_space<vmem>>, vector<16x8xf32>
    tpu.vector_store %arg5[%c0_7, %c0_8], %5 {strides = array<i32>} : memref<16x8xf32, #tpu.memory_space<vmem>>, vector<16x8xf32>,
    %c0_9 = arith.constant 0 : index
    %c0_10 = arith.constant 0 : index
    %7 = tpu.strided_load %arg5[%c0_9, %c0_10] {strides = array<i32: 2, 1>} : memref<16x8xf32, #tpu.memory_space<vmem>>, vector<8x8xf32>
    %c0_11 = arith.constant 0 : index
    %c0_12 = arith.constant 0 : index
    %c0_13 = arith.constant 0 : index
    %c0_14 = arith.constant 0 : index
    %8 = vector.load %arg3[%c0_11, %c0_12, %c0_13, %c0_14] : memref<1x16x8x8xf32, #tpu.memory_space<vmem>>, vector<1x1x8x8xf32>
    %9 = vector.shape_cast %8 : vector<1x1x8x8xf32> to vector<8x8xf32>
    %10 = vector.shape_cast %7 : vector<8x8xf32> to vector<1x1x8x8xf32>
    tpu.vector_store %arg3[%c0_11, %c0_12, %c0_13, %c0_14], %10 {strides = array<i32>} : memref<1x16x8x8xf32, #tpu.memory_space<vmem>>, vector<1x1x8x8xf32>,
    %c1 = arith.constant 1 : index
    %c0_15 = arith.constant 0 : index
    %11 = tpu.strided_load %arg5[%c1, %c0_15] {strides = array<i32: 2, 1>} : memref<16x8xf32, #tpu.memory_space<vmem>>, vector<8x8xf32>
    %c0_16 = arith.constant 0 : index
    %c8 = arith.constant 8 : index
    %c0_17 = arith.constant 0 : index
    %c0_18 = arith.constant 0 : index
    %12 = vector.load %arg3[%c0_16, %c8, %c0_17, %c0_18] : memref<1x16x8x8xf32, #tpu.memory_space<vmem>>, vector<1x1x8x8xf32>
    %13 = vector.shape_cast %12 : vector<1x1x8x8xf32> to vector<8x8xf32>
    %14 = vector.shape_cast %11 : vector<8x8xf32> to vector<1x1x8x8xf32>
    tpu.vector_store %arg3[%c0_16, %c8, %c0_17, %c0_18], %14 {strides = array<i32>} : memref<1x16x8x8xf32, #tpu.memory_space<vmem>>, vector<1x1x8x8xf32>,
    %c1_19 = arith.constant 1 : index
    %c0_20 = arith.constant 0 : index
    %15 = tpu.strided_load %arg4[%c1_19, %c0_20] {strides = array<i32: 2, 1>} : memref<16x16xf32, #tpu.memory_space<vmem>>, vector<8x16xf32>
    %16 = tpu.transpose %15, [1, 0] : vector<8x16xf32> -> vector<16x8xf32>
    %c0_21 = arith.constant 0 : index
    %c0_22 = arith.constant 0 : index
    %17 = vector.load %arg5[%c0_21, %c0_22] : memref<16x8xf32, #tpu.memory_space<vmem>>, vector<16x8xf32>
    tpu.vector_store %arg5[%c0_21, %c0_22], %16 {strides = array<i32>} : memref<16x8xf32, #tpu.memory_space<vmem>>, vector<16x8xf32>,
    %c0_23 = arith.constant 0 : index
    %c0_24 = arith.constant 0 : index
    %18 = tpu.strided_load %arg5[%c0_23, %c0_24] {strides = array<i32: 2, 1>} : memref<16x8xf32, #tpu.memory_space<vmem>>, vector<8x8xf32>
    %c0_25 = arith.constant 0 : index
    %c4 = arith.constant 4 : index
    %c0_26 = arith.constant 0 : index
    %c0_27 = arith.constant 0 : index
    %19 = vector.load %arg3[%c0_25, %c4, %c0_26, %c0_27] : memref<1x16x8x8xf32, #tpu.memory_space<vmem>>, vector<1x1x8x8xf32>
    %20 = vector.shape_cast %19 : vector<1x1x8x8xf32> to vector<8x8xf32>
    %21 = vector.shape_cast %18 : vector<8x8xf32> to vector<1x1x8x8xf32>
    tpu.vector_store %arg3[%c0_25, %c4, %c0_26, %c0_27], %21 {strides = array<i32>} : memref<1x16x8x8xf32, #tpu.memory_space<vmem>>, vector<1x1x8x8xf32>,
    %c1_28 = arith.constant 1 : index
    %c0_29 = arith.constant 0 : index
    %22 = tpu.strided_load %arg5[%c1_28, %c0_29] {strides = array<i32: 2, 1>} : memref<16x8xf32, #tpu.memory_space<vmem>>, vector<8x8xf32>
    %c0_30 = arith.constant 0 : index
    %c12 = arith.constant 12 : index
    %c0_31 = arith.constant 0 : index
    %c0_32 = arith.constant 0 : index
    %23 = vector.load %arg3[%c0_30, %c12, %c0_31, %c0_32] : memref<1x16x8x8xf32, #tpu.memory_space<vmem>>, vector<1x1x8x8xf32>
    %24 = vector.shape_cast %23 : vector<1x1x8x8xf32> to vector<8x8xf32>
    %25 = vector.shape_cast %22 : vector<8x8xf32> to vector<1x1x8x8xf32>
    tpu.vector_store %arg3[%c0_30, %c12, %c0_31, %c0_32], %25 {strides = array<i32>} : memref<1x16x8x8xf32, #tpu.memory_space<vmem>>, vector<1x1x8x8xf32>,
    %c0_33 = arith.constant 0 : index
    %c1_34 = arith.constant 1 : index
    %c0_35 = arith.constant 0 : index
    %c0_36 = arith.constant 0 : index
    %26 = vector.load %arg2[%c0_33, %c1_34, %c0_35, %c0_36] : memref<1x4x16x16xf32, #tpu.memory_space<vmem>>, vector<1x1x16x16xf32>
    %27 = vector.shape_cast %26 : vector<1x1x16x16xf32> to vector<16x16xf32>
    %28 = tpu.transpose %27, [1, 0] : vector<16x16xf32> -> vector<16x16xf32>
    %c0_37 = arith.constant 0 : index
    %c0_38 = arith.constant 0 : index
    %29 = vector.load %arg4[%c0_37, %c0_38] : memref<16x16xf32, #tpu.memory_space<vmem>>, vector<16x16xf32>
    tpu.vector_store %arg4[%c0_37, %c0_38], %28 {strides = array<i32>} : memref<16x16xf32, #tpu.memory_space<vmem>>, vector<16x16xf32>,
    %c0_39 = arith.constant 0 : index
    %c0_40 = arith.constant 0 : index
    %30 = tpu.strided_load %arg4[%c0_39, %c0_40] {strides = array<i32: 2, 1>} : memref<16x16xf32, #tpu.memory_space<vmem>>, vector<8x16xf32>
    %31 = tpu.transpose %30, [1, 0] : vector<8x16xf32> -> vector<16x8xf32>
    %c0_41 = arith.constant 0 : index
    %c0_42 = arith.constant 0 : index
    %32 = vector.load %arg5[%c0_41, %c0_42] : memref<16x8xf32, #tpu.memory_space<vmem>>, vector<16x8xf32>
    tpu.vector_store %arg5[%c0_41, %c0_42], %31 {strides = array<i32>} : memref<16x8xf32, #tpu.memory_space<vmem>>, vector<16x8xf32>,
    %c0_43 = arith.constant 0 : index
    %c0_44 = arith.constant 0 : index
    %33 = tpu.strided_load %arg5[%c0_43, %c0_44] {strides = array<i32: 2, 1>} : memref<16x8xf32, #tpu.memory_space<vmem>>, vector<8x8xf32>
    %c0_45 = arith.constant 0 : index
    %c1_46 = arith.constant 1 : index
    %c0_47 = arith.constant 0 : index
    %c0_48 = arith.constant 0 : index
    %34 = vector.load %arg3[%c0_45, %c1_46, %c0_47, %c0_48] : memref<1x16x8x8xf32, #tpu.memory_space<vmem>>, vector<1x1x8x8xf32>
    %35 = vector.shape_cast %34 : vector<1x1x8x8xf32> to vector<8x8xf32>
    %36 = vector.shape_cast %33 : vector<8x8xf32> to vector<1x1x8x8xf32>
    tpu.vector_store %arg3[%c0_45, %c1_46, %c0_47, %c0_48], %36 {strides = array<i32>} : memref<1x16x8x8xf32, #tpu.memory_space<vmem>>, vector<1x1x8x8xf32>,
    %c1_49 = arith.constant 1 : index
    %c0_50 = arith.constant 0 : index
    %37 = tpu.strided_load %arg5[%c1_49, %c0_50] {strides = array<i32: 2, 1>} : memref<16x8xf32, #tpu.memory_space<vmem>>, vector<8x8xf32>
    %c0_51 = arith.constant 0 : index
    %c9 = arith.constant 9 : index
    %c0_52 = arith.constant 0 : index
    %c0_53 = arith.constant 0 : index
    %38 = vector.load %arg3[%c0_51, %c9, %c0_52, %c0_53] : memref<1x16x8x8xf32, #tpu.memory_space<vmem>>, vector<1x1x8x8xf32>
    %39 = vector.shape_cast %38 : vector<1x1x8x8xf32> to vector<8x8xf32>
    %40 = vector.shape_cast %37 : vector<8x8xf32> to vector<1x1x8x8xf32>
    tpu.vector_store %arg3[%c0_51, %c9, %c0_52, %c0_53], %40 {strides = array<i32>} : memref<1x16x8x8xf32, #tpu.memory_space<vmem>>, vector<1x1x8x8xf32>,
    %c1_54 = arith.constant 1 : index
    %c0_55 = arith.constant 0 : index
    %41 = tpu.strided_load %arg4[%c1_54, %c0_55] {strides = array<i32: 2, 1>} : memref<16x16xf32, #tpu.memory_space<vmem>>, vector<8x16xf32>
    %42 = tpu.transpose %41, [1, 0] : vector<8x16xf32> -> vector<16x8xf32>
    %c0_56 = arith.constant 0 : index
    %c0_57 = arith.constant 0 : index
    %43 = vector.load %arg5[%c0_56, %c0_57] : memref<16x8xf32, #tpu.memory_space<vmem>>, vector<16x8xf32>
    tpu.vector_store %arg5[%c0_56, %c0_57], %42 {strides = array<i32>} : memref<16x8xf32, #tpu.memory_space<vmem>>, vector<16x8xf32>,
    %c0_58 = arith.constant 0 : index
    %c0_59 = arith.constant 0 : index
    %44 = tpu.strided_load %arg5[%c0_58, %c0_59] {strides = array<i32: 2, 1>} : memref<16x8xf32, #tpu.memory_space<vmem>>, vector<8x8xf32>
    %c0_60 = arith.constant 0 : index
    %c5 = arith.constant 5 : index
    %c0_61 = arith.constant 0 : index
    %c0_62 = arith.constant 0 : index
    %45 = vector.load %arg3[%c0_60, %c5, %c0_61, %c0_62] : memref<1x16x8x8xf32, #tpu.memory_space<vmem>>, vector<1x1x8x8xf32>
    %46 = vector.shape_cast %45 : vector<1x1x8x8xf32> to vector<8x8xf32>
    %47 = vector.shape_cast %44 : vector<8x8xf32> to vector<1x1x8x8xf32>
    tpu.vector_store %arg3[%c0_60, %c5, %c0_61, %c0_62], %47 {strides = array<i32>} : memref<1x16x8x8xf32, #tpu.memory_space<vmem>>, vector<1x1x8x8xf32>,
    %c1_63 = arith.constant 1 : index
    %c0_64 = arith.constant 0 : index
    %48 = tpu.strided_load %arg5[%c1_63, %c0_64] {strides = array<i32: 2, 1>} : memref<16x8xf32, #tpu.memory_space<vmem>>, vector<8x8xf32>
    %c0_65 = arith.constant 0 : index
    %c13 = arith.constant 13 : index
    %c0_66 = arith.constant 0 : index
    %c0_67 = arith.constant 0 : index
    %49 = vector.load %arg3[%c0_65, %c13, %c0_66, %c0_67] : memref<1x16x8x8xf32, #tpu.memory_space<vmem>>, vector<1x1x8x8xf32>
    %50 = vector.shape_cast %49 : vector<1x1x8x8xf32> to vector<8x8xf32>
    %51 = vector.shape_cast %48 : vector<8x8xf32> to vector<1x1x8x8xf32>
    tpu.vector_store %arg3[%c0_65, %c13, %c0_66, %c0_67], %51 {strides = array<i32>} : memref<1x16x8x8xf32, #tpu.memory_space<vmem>>, vector<1x1x8x8xf32>,
    %c0_68 = arith.constant 0 : index
    %c2 = arith.constant 2 : index
    %c0_69 = arith.constant 0 : index
    %c0_70 = arith.constant 0 : index
    %52 = vector.load %arg2[%c0_68, %c2, %c0_69, %c0_70] : memref<1x4x16x16xf32, #tpu.memory_space<vmem>>, vector<1x1x16x16xf32>
    %53 = vector.shape_cast %52 : vector<1x1x16x16xf32> to vector<16x16xf32>
    %54 = tpu.transpose %53, [1, 0] : vector<16x16xf32> -> vector<16x16xf32>
    %c0_71 = arith.constant 0 : index
    %c0_72 = arith.constant 0 : index
    %55 = vector.load %arg4[%c0_71, %c0_72] : memref<16x16xf32, #tpu.memory_space<vmem>>, vector<16x16xf32>
    tpu.vector_store %arg4[%c0_71, %c0_72], %54 {strides = array<i32>} : memref<16x16xf32, #tpu.memory_space<vmem>>, vector<16x16xf32>,
    %c0_73 = arith.constant 0 : index
    %c0_74 = arith.constant 0 : index
    %56 = tpu.strided_load %arg4[%c0_73, %c0_74] {strides = array<i32: 2, 1>} : memref<16x16xf32, #tpu.memory_space<vmem>>, vector<8x16xf32>
    %57 = tpu.transpose %56, [1, 0] : vector<8x16xf32> -> vector<16x8xf32>
    %c0_75 = arith.constant 0 : index
    %c0_76 = arith.constant 0 : index
    %58 = vector.load %arg5[%c0_75, %c0_76] : memref<16x8xf32, #tpu.memory_space<vmem>>, vector<16x8xf32>
    tpu.vector_store %arg5[%c0_75, %c0_76], %57 {strides = array<i32>} : memref<16x8xf32, #tpu.memory_space<vmem>>, vector<16x8xf32>,
    %c0_77 = arith.constant 0 : index
    %c0_78 = arith.constant 0 : index
    %59 = tpu.strided_load %arg5[%c0_77, %c0_78] {strides = array<i32: 2, 1>} : memref<16x8xf32, #tpu.memory_space<vmem>>, vector<8x8xf32>
    %c0_79 = arith.constant 0 : index
    %c2_80 = arith.constant 2 : index
    %c0_81 = arith.constant 0 : index
    %c0_82 = arith.constant 0 : index
    %60 = vector.load %arg3[%c0_79, %c2_80, %c0_81, %c0_82] : memref<1x16x8x8xf32, #tpu.memory_space<vmem>>, vector<1x1x8x8xf32>
    %61 = vector.shape_cast %60 : vector<1x1x8x8xf32> to vector<8x8xf32>
    %62 = vector.shape_cast %59 : vector<8x8xf32> to vector<1x1x8x8xf32>
    tpu.vector_store %arg3[%c0_79, %c2_80, %c0_81, %c0_82], %62 {strides = array<i32>} : memref<1x16x8x8xf32, #tpu.memory_space<vmem>>, vector<1x1x8x8xf32>,
    %c1_83 = arith.constant 1 : index
    %c0_84 = arith.constant 0 : index
    %63 = tpu.strided_load %arg5[%c1_83, %c0_84] {strides = array<i32: 2, 1>} : memref<16x8xf32, #tpu.memory_space<vmem>>, vector<8x8xf32>
    %c0_85 = arith.constant 0 : index
    %c10 = arith.constant 10 : index
    %c0_86 = arith.constant 0 : index
    %c0_87 = arith.constant 0 : index
    %64 = vector.load %arg3[%c0_85, %c10, %c0_86, %c0_87] : memref<1x16x8x8xf32, #tpu.memory_space<vmem>>, vector<1x1x8x8xf32>
    %65 = vector.shape_cast %64 : vector<1x1x8x8xf32> to vector<8x8xf32>
    %66 = vector.shape_cast %63 : vector<8x8xf32> to vector<1x1x8x8xf32>
    tpu.vector_store %arg3[%c0_85, %c10, %c0_86, %c0_87], %66 {strides = array<i32>} : memref<1x16x8x8xf32, #tpu.memory_space<vmem>>, vector<1x1x8x8xf32>,
    %c1_88 = arith.constant 1 : index
    %c0_89 = arith.constant 0 : index
    %67 = tpu.strided_load %arg4[%c1_88, %c0_89] {strides = array<i32: 2, 1>} : memref<16x16xf32, #tpu.memory_space<vmem>>, vector<8x16xf32>
    %68 = tpu.transpose %67, [1, 0] : vector<8x16xf32> -> vector<16x8xf32>
    %c0_90 = arith.constant 0 : index
    %c0_91 = arith.constant 0 : index
    %69 = vector.load %arg5[%c0_90, %c0_91] : memref<16x8xf32, #tpu.memory_space<vmem>>, vector<16x8xf32>
    tpu.vector_store %arg5[%c0_90, %c0_91], %68 {strides = array<i32>} : memref<16x8xf32, #tpu.memory_space<vmem>>, vector<16x8xf32>,
    %c0_92 = arith.constant 0 : index
    %c0_93 = arith.constant 0 : index
    %70 = tpu.strided_load %arg5[%c0_92, %c0_93] {strides = array<i32: 2, 1>} : memref<16x8xf32, #tpu.memory_space<vmem>>, vector<8x8xf32>
    %c0_94 = arith.constant 0 : index
    %c6 = arith.constant 6 : index
    %c0_95 = arith.constant 0 : index
    %c0_96 = arith.constant 0 : index
    %71 = vector.load %arg3[%c0_94, %c6, %c0_95, %c0_96] : memref<1x16x8x8xf32, #tpu.memory_space<vmem>>, vector<1x1x8x8xf32>
    %72 = vector.shape_cast %71 : vector<1x1x8x8xf32> to vector<8x8xf32>
    %73 = vector.shape_cast %70 : vector<8x8xf32> to vector<1x1x8x8xf32>
    tpu.vector_store %arg3[%c0_94, %c6, %c0_95, %c0_96], %73 {strides = array<i32>} : memref<1x16x8x8xf32, #tpu.memory_space<vmem>>, vector<1x1x8x8xf32>,
    %c1_97 = arith.constant 1 : index
    %c0_98 = arith.constant 0 : index
    %74 = tpu.strided_load %arg5[%c1_97, %c0_98] {strides = array<i32: 2, 1>} : memref<16x8xf32, #tpu.memory_space<vmem>>, vector<8x8xf32>
    %c0_99 = arith.constant 0 : index
    %c14 = arith.constant 14 : index
    %c0_100 = arith.constant 0 : index
    %c0_101 = arith.constant 0 : index
    %75 = vector.load %arg3[%c0_99, %c14, %c0_100, %c0_101] : memref<1x16x8x8xf32, #tpu.memory_space<vmem>>, vector<1x1x8x8xf32>
    %76 = vector.shape_cast %75 : vector<1x1x8x8xf32> to vector<8x8xf32>
    %77 = vector.shape_cast %74 : vector<8x8xf32> to vector<1x1x8x8xf32>
    tpu.vector_store %arg3[%c0_99, %c14, %c0_100, %c0_101], %77 {strides = array<i32>} : memref<1x16x8x8xf32, #tpu.memory_space<vmem>>, vector<1x1x8x8xf32>,
    %c0_102 = arith.constant 0 : index
    %c3 = arith.constant 3 : index
    %c0_103 = arith.constant 0 : index
    %c0_104 = arith.constant 0 : index
    %78 = vector.load %arg2[%c0_102, %c3, %c0_103, %c0_104] : memref<1x4x16x16xf32, #tpu.memory_space<vmem>>, vector<1x1x16x16xf32>
    %79 = vector.shape_cast %78 : vector<1x1x16x16xf32> to vector<16x16xf32>
    %80 = tpu.transpose %79, [1, 0] : vector<16x16xf32> -> vector<16x16xf32>
    %c0_105 = arith.constant 0 : index
    %c0_106 = arith.constant 0 : index
    %81 = vector.load %arg4[%c0_105, %c0_106] : memref<16x16xf32, #tpu.memory_space<vmem>>, vector<16x16xf32>
    tpu.vector_store %arg4[%c0_105, %c0_106], %80 {strides = array<i32>} : memref<16x16xf32, #tpu.memory_space<vmem>>, vector<16x16xf32>,
    %c0_107 = arith.constant 0 : index
    %c0_108 = arith.constant 0 : index
    %82 = tpu.strided_load %arg4[%c0_107, %c0_108] {strides = array<i32: 2, 1>} : memref<16x16xf32, #tpu.memory_space<vmem>>, vector<8x16xf32>
    %83 = tpu.transpose %82, [1, 0] : vector<8x16xf32> -> vector<16x8xf32>
    %c0_109 = arith.constant 0 : index
    %c0_110 = arith.constant 0 : index
    %84 = vector.load %arg5[%c0_109, %c0_110] : memref<16x8xf32, #tpu.memory_space<vmem>>, vector<16x8xf32>
    tpu.vector_store %arg5[%c0_109, %c0_110], %83 {strides = array<i32>} : memref<16x8xf32, #tpu.memory_space<vmem>>, vector<16x8xf32>,
    %c0_111 = arith.constant 0 : index
    %c0_112 = arith.constant 0 : index
    %85 = tpu.strided_load %arg5[%c0_111, %c0_112] {strides = array<i32: 2, 1>} : memref<16x8xf32, #tpu.memory_space<vmem>>, vector<8x8xf32>
    %c0_113 = arith.constant 0 : index
    %c3_114 = arith.constant 3 : index
    %c0_115 = arith.constant 0 : index
    %c0_116 = arith.constant 0 : index
    %86 = vector.load %arg3[%c0_113, %c3_114, %c0_115, %c0_116] : memref<1x16x8x8xf32, #tpu.memory_space<vmem>>, vector<1x1x8x8xf32>
    %87 = vector.shape_cast %86 : vector<1x1x8x8xf32> to vector<8x8xf32>
    %88 = vector.shape_cast %85 : vector<8x8xf32> to vector<1x1x8x8xf32>
    tpu.vector_store %arg3[%c0_113, %c3_114, %c0_115, %c0_116], %88 {strides = array<i32>} : memref<1x16x8x8xf32, #tpu.memory_space<vmem>>, vector<1x1x8x8xf32>,
    %c1_117 = arith.constant 1 : index
    %c0_118 = arith.constant 0 : index
    %89 = tpu.strided_load %arg5[%c1_117, %c0_118] {strides = array<i32: 2, 1>} : memref<16x8xf32, #tpu.memory_space<vmem>>, vector<8x8xf32>
    %c0_119 = arith.constant 0 : index
    %c11 = arith.constant 11 : index
    %c0_120 = arith.constant 0 : index
    %c0_121 = arith.constant 0 : index
    %90 = vector.load %arg3[%c0_119, %c11, %c0_120, %c0_121] : memref<1x16x8x8xf32, #tpu.memory_space<vmem>>, vector<1x1x8x8xf32>
    %91 = vector.shape_cast %90 : vector<1x1x8x8xf32> to vector<8x8xf32>
    %92 = vector.shape_cast %89 : vector<8x8xf32> to vector<1x1x8x8xf32>
    tpu.vector_store %arg3[%c0_119, %c11, %c0_120, %c0_121], %92 {strides = array<i32>} : memref<1x16x8x8xf32, #tpu.memory_space<vmem>>, vector<1x1x8x8xf32>,
    %c1_122 = arith.constant 1 : index
    %c0_123 = arith.constant 0 : index
    %93 = tpu.strided_load %arg4[%c1_122, %c0_123] {strides = array<i32: 2, 1>} : memref<16x16xf32, #tpu.memory_space<vmem>>, vector<8x16xf32>
    %94 = tpu.transpose %93, [1, 0] : vector<8x16xf32> -> vector<16x8xf32>
    %c0_124 = arith.constant 0 : index
    %c0_125 = arith.constant 0 : index
    %95 = vector.load %arg5[%c0_124, %c0_125] : memref<16x8xf32, #tpu.memory_space<vmem>>, vector<16x8xf32>
    tpu.vector_store %arg5[%c0_124, %c0_125], %94 {strides = array<i32>} : memref<16x8xf32, #tpu.memory_space<vmem>>, vector<16x8xf32>,
    %c0_126 = arith.constant 0 : index
    %c0_127 = arith.constant 0 : index
    %96 = tpu.strided_load %arg5[%c0_126, %c0_127] {strides = array<i32: 2, 1>} : memref<16x8xf32, #tpu.memory_space<vmem>>, vector<8x8xf32>
    %c0_128 = arith.constant 0 : index
    %c7 = arith.constant 7 : index
    %c0_129 = arith.constant 0 : index
    %c0_130 = arith.constant 0 : index
    %97 = vector.load %arg3[%c0_128, %c7, %c0_129, %c0_130] : memref<1x16x8x8xf32, #tpu.memory_space<vmem>>, vector<1x1x8x8xf32>
    %98 = vector.shape_cast %97 : vector<1x1x8x8xf32> to vector<8x8xf32>
    %99 = vector.shape_cast %96 : vector<8x8xf32> to vector<1x1x8x8xf32>
    tpu.vector_store %arg3[%c0_128, %c7, %c0_129, %c0_130], %99 {strides = array<i32>} : memref<1x16x8x8xf32, #tpu.memory_space<vmem>>, vector<1x1x8x8xf32>,
    %c1_131 = arith.constant 1 : index
    %c0_132 = arith.constant 0 : index
    %100 = tpu.strided_load %arg5[%c1_131, %c0_132] {strides = array<i32: 2, 1>} : memref<16x8xf32, #tpu.memory_space<vmem>>, vector<8x8xf32>
    %c0_133 = arith.constant 0 : index
    %c15 = arith.constant 15 : index
    %c0_134 = arith.constant 0 : index
    %c0_135 = arith.constant 0 : index
    %101 = vector.load %arg3[%c0_133, %c15, %c0_134, %c0_135] : memref<1x16x8x8xf32, #tpu.memory_space<vmem>>, vector<1x1x8x8xf32>
    %102 = vector.shape_cast %101 : vector<1x1x8x8xf32> to vector<8x8xf32>
    %103 = vector.shape_cast %100 : vector<8x8xf32> to vector<1x1x8x8xf32>
    tpu.vector_store %arg3[%c0_133, %c15, %c0_134, %c0_135], %103 {strides = array<i32>} : memref<1x16x8x8xf32, #tpu.memory_space<vmem>>, vector<1x1x8x8xf32>,
    return
  }
  func.func @transform_0(%arg0: i32, %arg1: i32) -> (i32, i32, i32, i32) {
    %c0_i32 = arith.constant 0 : i32
    %c0_i32_0 = arith.constant 0 : i32
    %c0_i32_1 = arith.constant 0 : i32
    return %arg0, %c0_i32, %arg1, %c0_i32_0 : i32, i32, i32, i32
  }
  func.func @transform_1(%arg0: i32, %arg1: i32) -> (i32, i32, i32, i32) {
    %c0_i32 = arith.constant 0 : i32
    %c0_i32_0 = arith.constant 0 : i32
    %c0_i32_1 = arith.constant 0 : i32
    return %arg0, %c0_i32, %arg1, %c0_i32_0 : i32, i32, i32, i32
  }
}

</mosaic_0001>

<bundles_post_ra>
// kernel: tpu_custom_call.1
= control target key start
LH: loop header
LB: loop body
LE: loop exit
PB: predicated region body
PF: predicated region fallthrough
CT: control target
= control target key end

     0   :  { %6 = vsyncpa [#allocation5], 0  ;;  %s1078_s0 = inlined_call_operand.hbm [shape: f32[2,4,16,16], index: 0, kind: input, shape index: {}]   ;;  %s1079_s1 = inlined_call_operand.vmem [shape: f32[2,16,8,8], index: 1, kind: output, shape index: {}]  }
   0x1   :  { %8 = vsyncpa [#allocation5 + $0x1], 0  ;;  %s922_s6 = smov 0   ;;  %s924_s7 = smov 0  }
   0x2   :  { %s926_s8 = smov 0   ;;  %s928_s9 = smov 0  }
   0x3   :  { %s930_s10 = smov 0   ;;  %s932_s11 = smov 0  }
   0x4 LB: > { %s734_s12 = sadd.s32 4294967295, %s908_s11   ;;  %s26_s13 = sadd.s32 1, %s904_s10  ;;  %s908_s11 = sphi %s932_s11, %s14_s11   ;;  %s904_s10 = sphi %s930_s10, %s1086_s10   ;;  %s900_s9 = sphi %s928_s9, %s1085_s9   ;;  %s896_s8 = sphi %s926_s8, %s1084_s8   ;;  %s892_s7 = sphi %s924_s7, %s1083_s7   ;;  %s888_s6 = sphi %s922_s6, %s1082_s6  }
   0x5   : > { %p28_p0 = scmp.ge.s32.totalorder %s26_s13, 2  ;;  %s35_s14 = sadd.s32 1, %s896_s8 }
   0x6   : > { %p42_p1 = scmp.ne.s32.totalorder %s896_s8, %s892_s7  ;;  %p43_p2 = scmp.eq.s32.totalorder %s908_s11, 0 }
   0x7   : > { %s1088_s13 = smov (%p28_p0, %s26_s13), 0  ;;  %p48_p4 = scmp.ne.s32.totalorder %s892_s7, %s888_s6 }
   0x8   : > { %p958_p3 = por %p43_p2, %p42_p1  ;;  %s30_s16 = ssub.s32 %s904_s10, %s1088_s13 }
   0x9   : > { %p49_p5 = scmp.eq.s32.totalorder %s734_s12, 0  ;;  %p33_p6 = scmp.eq.s32.totalorder %s30_s16, 0 }
   0xa   : > { %p776_p8 = scmp.lt.s32.totalorder %s908_s11, 2  ;;  %s100_s19 = sand.u32 1, %s896_s8  }
   0xb   : > { %p965_p7 = por %p49_p5, %p48_p4  ;;  %s768_s20 = sshll.u32 %s904_s10, 6 }
   0xc   : > { %s971_s18 = scalar_select %p33_p6, %s896_s8, %s35_s14  }
   0xd   : > { %s738_s21 = sshll.u32 %s100_s19, 6  ;;  %s111_s24 = scalar_lea.hbm %s1078_s0, %s768_s20 }
   0xe   : > { %s112_s25 = sshll.u32 %s111_s24, 4  ;;  %s104_s26 = scalar_lea.vmem [#allocation4], %s738_s21  ;;  %s113_s25 = int_to_ptr.hbm [resolvable:$true] %s112_s25 }
   0xf   : > { %s114_s27 = sshll.u32 %s104_s26, 4  ;;  %p773_p9 = pnand %p776_p8, %p958_p3  ;;  %s115_s27 = int_to_ptr.vmem [resolvable:$true] %s114_s27 }
  0x10   : > { %p741_p10 = scmp.ge.s32.totalorder %s908_s11, 1  ;;  %p122_p11 = scmp.lt.s32.totalorder %s908_s11, 3 }
  0x11   : > { %s101_s28 = scalar_lea.sflag [#allocation5], %s100_s19  ;;  %s910_s29 = smov 128  }
  0x12   : > { %s911_s30 = smov 8   ;;  %p123_p12 = pnand %p741_p10, %p122_p11 }
  0x13   : > { %775 = dma.hbm_to_vmem [thread:$0]  (!%p773_p9), %s113_s25, 1024, %s115_s27, %s101_s28, %s910_s29, %s910_s29, %s911_s30  }
  0x14   : > { %126 = sbr.rel (%p123_p12) target bundleno = 599 (0x257), region = 24  ;;  %s128_s2 = sand.u32 (!%p123_p12), 1, %s892_s7  }
  0x15   : > { %s742_s3 = sshll.u32 (!%p123_p12), %s128_s2, 6  ;;  %s129_s4 = scalar_lea.sflag (!%p123_p12), [#allocation5], %s128_s2 }
  0x16   : > { %s983_s5 = scalar_lea.vmem (!%p123_p12), [#allocation4], %s742_s3 }
  0x19   : > { %883 = dma.done.wait (%p965_p7), %s129_s4, 1024  }
  0x1a   : > { %885 = vsyncadd (%p965_p7), %s129_s4, 4294966272  ;;  %v164_v0 = vld [vmem:[%s983_s5] sm:$0xff]  ;;  %v748_v1 = vld [vmem:[%s983_s5 + $0x10] sm:$0xff]  ;;  %vm198_vm0 = vcmask 130048   ;;  %vm234_vm1 = vcmask 64512   ;;  %p156_p13 = scmp.lt.s32.totalorder %s900_s9, 1 }
  0x1b   : > { %166 = vxpose.xlu0.b32.start [1/2] (short) (narrow) %v164_v0, 16  ;;  %288 = vxpose.xlu1.b32.start [1/2] (short) (narrow) %v748_v1, 16  ;;  %v165_v2 = vld [vmem:[%s983_s5 + $0x8] sm:$0xff]  ;;  %v749_v3 = vld [vmem:[%s983_s5 + $0x18] sm:$0xff]  ;;  %v760_v11 = vld [vmem:[%s983_s5 + $0x30] sm:$0xff] }
  0x1c   : > { %v754_v12 = vld [vmem:[%s983_s5 + $0x20] sm:$0xff]  ;;  %v761_v13 = vld [vmem:[%s983_s5 + $0x38] sm:$0xff]  ;;  %v755_v14 = vld [vmem:[%s983_s5 + $0x28] sm:$0xff]  ;;  %s1090_s9 = smov (!%p156_p13, %s900_s9), 1 }
  0x1d   : > { %s769_s6 = sshll.u32 %s1090_s9, 7 }
  0x1e   : > { %s1008_s15 = scalar_lea.vmem %s1079_s1, %s769_s6 }
  0x23   : > { %167 = vxpose.xlu0.b32.end [2/2] (short) (narrow) %v165_v2, 16  ;;  %289 = vxpose.xlu1.b32.end [2/2] (short) (narrow) %v749_v3, 16 }
  0xbf   : > { %v182_v4 = vpop.trf.xlu0  ;;  %v304_v6 = vpop.trf.xlu1 }
  0xc0   : > { %199 = vst.msk [vmem:[#allocation2] sm:$0xff] %vm198_vm0, %v182_v4 }
  0xc7   : > { %v183_v5 = vpop.trf.xlu0  ;;  %v305_v9 = vpop.trf.xlu1 }
  0xc8   : > { %200 = vst.msk [vmem:[#allocation2 + $0x8] sm:$0xff] %vm198_vm0, %v183_v5 }
  0xcf   : > { %v244_v7 = vld [vmem:[#allocation2 + $0x1] ss:$2 sm:$0xff]  ;;  %v201_v8 = vld [vmem:[#allocation2] ss:$2 sm:$0xff] }
  0xd0   : > { %245 = vxpose.xlu0.b32.start.end [1/1] (short) (narrow) %v244_v7, 16  ;;  %202 = vxpose.xlu2.b32.start.end [1/1] (short) (narrow) %v201_v8, 16  ;;  %320 = vst.msk [vmem:[#allocation2] sm:$0xff] %vm198_vm0, %v304_v6 }
  0xd1   : > { %321 = vst.msk [vmem:[#allocation2 + $0x8] sm:$0xff] %vm198_vm0, %v305_v9 }
  0xd8   : > { %v322_v10 = vld [vmem:[#allocation2] ss:$2 sm:$0xff]  ;;  %v363_v15 = vld [vmem:[#allocation2 + $0x1] ss:$2 sm:$0xff] }
  0xd9   : > { %323 = vxpose.xlu1.b32.start.end [1/1] (short) (narrow) %v322_v10, 16 }
  0xe0   : > { %526 = vxpose.xlu0.b32.start [1/2] (short) (narrow) %v760_v11, 16  ;;  %407 = vxpose.xlu2.b32.start [1/2] (short) (narrow) %v754_v12, 16 }
  0xe8   : > { %527 = vxpose.xlu0.b32.end [2/2] (short) (narrow) %v761_v13, 16  ;;  %408 = vxpose.xlu2.b32.end [2/2] (short) (narrow) %v755_v14, 16 }
  0xe9   : > { %364 = vxpose.xlu1.b32.start.end [1/1] (short) (narrow) %v363_v15, 16 }
 0x169   : > { %v218_v16 = vpop.trf.xlu2 }
 0x16a   : > { %235 = vst.msk [vmem:[#allocation3] sm:$0xff] %vm234_vm1, %v218_v16 }
 0x171   : > { %v219_v17 = vpop.trf.xlu2 }
 0x172   : > { %236 = vst.msk [vmem:[#allocation3 + $0x8] sm:$0xff] %vm234_vm1, %v219_v17 }
 0x174   : > { %v261_v18 = vpop.trf.xlu0 }
 0x179   : > { %v237_v19 = vld [vmem:[#allocation3] ss:$2 sm:$0xff]  ;;  %v240_v20 = vld [vmem:[#allocation3 + $0x1] ss:$2 sm:$0xff]  ;;  %v423_v21 = vpop.trf.xlu2 }
 0x17a   : > { %238 = vst.msk [vmem:[%s1008_s15] sm:$0xff] %vm234_vm1, %v237_v19 }
 0x17b   : > { %745 = vst.msk [vmem:[%s1008_s15 + $0x40] sm:$0xff] %vm234_vm1, %v240_v20 }
 0x17c   : > { %277 = vst.msk [vmem:[#allocation3] sm:$0xff] %vm234_vm1, %v261_v18  ;;  %v262_v22 = vpop.trf.xlu0 }
 0x17d   : > { %439 = vst.msk [vmem:[#allocation2] sm:$0xff] %vm198_vm0, %v423_v21  ;;  %v339_v23 = vpop.trf.xlu1 }
 0x17e   : > { %278 = vst.msk [vmem:[#allocation3 + $0x8] sm:$0xff] %vm234_vm1, %v262_v22 }
 0x181   : > { %v424_v24 = vpop.trf.xlu2 }
 0x182   : > { %440 = vst.msk [vmem:[#allocation2 + $0x8] sm:$0xff] %vm198_vm0, %v424_v24 }
 0x184   : > { %v542_v25 = vpop.trf.xlu0 }
 0x185   : > { %v279_v26 = vld [vmem:[#allocation3] ss:$2 sm:$0xff]  ;;  %v282_v27 = vld [vmem:[#allocation3 + $0x1] ss:$2 sm:$0xff]  ;;  %v340_v28 = vpop.trf.xlu1 }
 0x186   : > { %746 = vst.msk [vmem:[%s1008_s15 + $0x20] sm:$0xff] %vm234_vm1, %v279_v26 }
 0x187   : > { %747 = vst.msk [vmem:[%s1008_s15 + $0x60] sm:$0xff] %vm234_vm1, %v282_v27 }
 0x188   : > { %355 = vst.msk [vmem:[#allocation3] sm:$0xff] %vm234_vm1, %v339_v23 }
 0x189   : > { %v482_v29 = vld [vmem:[#allocation2 + $0x1] ss:$2 sm:$0xff]  ;;  %v441_v30 = vld [vmem:[#allocation2] ss:$2 sm:$0xff]  ;;  %356 = vst.msk [vmem:[#allocation3 + $0x8] sm:$0xff] %vm234_vm1, %v340_v28 }
 0x18a   : > { %483 = vxpose.xlu1.b32.start.end [1/1] (short) (narrow) %v482_v29, 16  ;;  %442 = vxpose.xlu2.b32.start.end [1/1] (short) (narrow) %v441_v30, 16  ;;  %558 = vst.msk [vmem:[#allocation2] sm:$0xff] %vm198_vm0, %v542_v25 }
 0x18c   : > { %v543_v31 = vpop.trf.xlu0 }
 0x18d   : > { %559 = vst.msk [vmem:[#allocation2 + $0x8] sm:$0xff] %vm198_vm0, %v543_v31  ;;  %v380_v32 = vpop.trf.xlu1 }
 0x190   : > { %v357_v33 = vld [vmem:[#allocation3] ss:$2 sm:$0xff]  ;;  %v360_v34 = vld [vmem:[#allocation3 + $0x1] ss:$2 sm:$0xff] }
 0x191   : > { %750 = vst.msk [vmem:[%s1008_s15 + $0x8] sm:$0xff] %vm234_vm1, %v357_v33 }
 0x192   : > { %751 = vst.msk [vmem:[%s1008_s15 + $0x48] sm:$0xff] %vm234_vm1, %v360_v34 }
 0x193   : > { %396 = vst.msk [vmem:[#allocation3] sm:$0xff] %vm234_vm1, %v380_v32 }
 0x194   : > { %v601_v35 = vld [vmem:[#allocation2 + $0x1] ss:$2 sm:$0xff]  ;;  %v560_v37 = vld [vmem:[#allocation2] ss:$2 sm:$0xff] }
 0x195   : > { %602 = vxpose.xlu0.b32.start.end [1/1] (short) (narrow) %v601_v35, 16  ;;  %v381_v36 = vpop.trf.xlu1 }
 0x196   : > { %397 = vst.msk [vmem:[#allocation3 + $0x8] sm:$0xff] %vm234_vm1, %v381_v36 }
 0x19a   : > { %561 = vxpose.xlu2.b32.start.end [1/1] (short) (narrow) %v560_v37, 16 }
 0x19d   : > { %v398_v38 = vld [vmem:[#allocation3] ss:$2 sm:$0xff]  ;;  %v401_v39 = vld [vmem:[#allocation3 + $0x1] ss:$2 sm:$0xff] }
 0x19e   : > { %752 = vst.msk [vmem:[%s1008_s15 + $0x28] sm:$0xff] %vm234_vm1, %v398_v38 }
 0x19f   : > { %753 = vst.msk [vmem:[%s1008_s15 + $0x68] sm:$0xff] %vm234_vm1, %v401_v39 }
 0x223   : > { %v458_v40 = vpop.trf.xlu2 }
 0x224   : > { %474 = vst.msk [vmem:[#allocation3] sm:$0xff] %vm234_vm1, %v458_v40 }
 0x22b   : > { %v459_v41 = vpop.trf.xlu2 }
 0x22c   : > { %475 = vst.msk [vmem:[#allocation3 + $0x8] sm:$0xff] %vm234_vm1, %v459_v41 }
 0x22e   : > { %v499_v42 = vpop.trf.xlu1 }
 0x233   : > { %v476_v43 = vld [vmem:[#allocation3] ss:$2 sm:$0xff]  ;;  %v479_v44 = vld [vmem:[#allocation3 + $0x1] ss:$2 sm:$0xff]  ;;  %v577_v45 = vpop.trf.xlu2 }
 0x234   : > { %756 = vst.msk [vmem:[%s1008_s15 + $0x10] sm:$0xff] %vm234_vm1, %v476_v43 }
 0x235   : > { %757 = vst.msk [vmem:[%s1008_s15 + $0x50] sm:$0xff] %vm234_vm1, %v479_v44 }
 0x236   : > { %515 = vst.msk [vmem:[#allocation3] sm:$0xff] %vm234_vm1, %v499_v42  ;;  %v500_v46 = vpop.trf.xlu1 }
 0x237   : > { %516 = vst.msk [vmem:[#allocation3 + $0x8] sm:$0xff] %vm234_vm1, %v500_v46 }
 0x239   : > { %v618_v50 = vpop.trf.xlu0 }
 0x23b   : > { %v578_v49 = vpop.trf.xlu2 }
 0x23e   : > { %v517_v47 = vld [vmem:[#allocation3] ss:$2 sm:$0xff]  ;;  %v520_v48 = vld [vmem:[#allocation3 + $0x1] ss:$2 sm:$0xff] }
 0x23f   : > { %758 = vst.msk [vmem:[%s1008_s15 + $0x30] sm:$0xff] %vm234_vm1, %v517_v47 }
 0x240   : > { %759 = vst.msk [vmem:[%s1008_s15 + $0x70] sm:$0xff] %vm234_vm1, %v520_v48 }
 0x241   : > { %593 = vst.msk [vmem:[#allocation3] sm:$0xff] %vm234_vm1, %v577_v45  ;;  %v619_v53 = vpop.trf.xlu0 }
 0x242   : > { %594 = vst.msk [vmem:[#allocation3 + $0x8] sm:$0xff] %vm234_vm1, %v578_v49 }
 0x249   : > { %v595_v51 = vld [vmem:[#allocation3] ss:$2 sm:$0xff]  ;;  %v598_v52 = vld [vmem:[#allocation3 + $0x1] ss:$2 sm:$0xff] }
 0x24a   : > { %762 = vst.msk [vmem:[%s1008_s15 + $0x18] sm:$0xff] %vm234_vm1, %v595_v51 }
 0x24b   : > { %763 = vst.msk [vmem:[%s1008_s15 + $0x58] sm:$0xff] %vm234_vm1, %v598_v52 }
 0x24c   : > { %634 = vst.msk [vmem:[#allocation3] sm:$0xff] %vm234_vm1, %v618_v50 }
 0x24d   : > { %635 = vst.msk [vmem:[#allocation3 + $0x8] sm:$0xff] %vm234_vm1, %v619_v53 }
 0x254   : > { %v636_v54 = vld [vmem:[#allocation3] ss:$2 sm:$0xff]  ;;  %v639_v55 = vld [vmem:[#allocation3 + $0x1] ss:$2 sm:$0xff] }
 0x255   : > { %764 = vst.msk [vmem:[%s1008_s15 + $0x38] sm:$0xff] %vm234_vm1, %v636_v54 }
 0x256   : > { %765 = vst.msk [vmem:[%s1008_s15 + $0x78] sm:$0xff] %vm234_vm1, %v639_v55 }
 0x257 PF: > { %s14_s11 = sadd.s32 1, %s908_s11   ;;  %s1082_s6 = smov %s892_s7 }
 0x258   : > { %p11_p0 = scmp.ge.s32.totalorder %s14_s11, 4   ;;  %s1083_s7 = smov %s896_s8 }
 0x259   : > { %s1084_s8 = smov %s971_s18  ;;  %s1085_s9 = smov %s904_s10 }
 0x25a   : > { %s1086_s10 = smov %s1088_s13  ;;  %13 = sbr.rel (!%p11_p0) target bundleno = 4 (0x4), region = 84 }
 0x25f   :  { %669 = vsyncpa [#allocation5], 1 }
 0x260   :  { %671 = vsyncpa [#allocation5 + $0x1], 1 }

</bundles_post_ra>
